<compile_context>
chip_gen: v7x
topology: tpu7x:2x2x1
jax: 0.10.0
libtpu: 0.0.40
codegen_flags: <defaults>
</compile_context>

<pallas_src>
import math

import jax
import jax.numpy as jnp
from jax.experimental import pallas as pl
from jax.experimental.pallas import tpu as pltpu


def _round_up(x, m):
    return ((x + m - 1) // m) * m


def _cdiv(a, b):
    return -(-a // b)


def _sublane_multiple(dtype):
    # Second-to-last block dim must respect sublane packing: f32 -> 8, bf16 -> 16, int8/fp8 -> 32.
    return {4: 8, 2: 16, 1: 32}.get(jnp.dtype(dtype).itemsize, 8)


# ---------------------------------------------------------------------------
# GEMM kernels
# ---------------------------------------------------------------------------
def _gemm_single_kernel(x_ref, w_ref, o_ref):
    # One grid point: the whole problem is VMEM-resident.
    o_ref[...] = jnp.dot(
        x_ref[...], w_ref[...], preferred_element_type=jnp.float32
    ).astype(o_ref.dtype)


def _gemm_tiled_kernel(x_ref, w_ref, o_ref, acc_ref):
    # grid = (M tiles, N tiles, K tiles); K is last ("arbitrary").
    # Accumulate in an f32 VMEM scratch; write the output block once, in out_dtype,
    # on the final K step (out_shape is already the final dtype -> single HBM write).
    @pl.when(pl.program_id(2) == 0)
    def _():
        acc_ref[...] = jnp.zeros_like(acc_ref)

    acc_ref[...] += jnp.dot(x_ref[...], w_ref[...], preferred_element_type=jnp.float32)

    @pl.when(pl.program_id(2) == pl.num_programs(2) - 1)
    def _():
        o_ref[...] = acc_ref[...].astype(o_ref.dtype)


def gemm(x2d, w_t, *, out_dtype=None):
    """out[M, N] = x2d[M, K] @ w_t[K, N]  (== x @ W.T for a bias-free PyTorch Linear)."""
    M, K = x2d.shape
    K2, N = w_t.shape
    assert K == K2, (K, K2)
    out_dtype = jnp.dtype(x2d.dtype if out_dtype is None else out_dtype)
    xb = jnp.dtype(x2d.dtype).itemsize
    wb = jnp.dtype(w_t.dtype).itemsize
    ob = out_dtype.itemsize

    cost = pl.CostEstimate(
        flops=2 * M * K * N,
        transcendentals=0,
        bytes_accessed=M * K * xb + K * N * wb + M * N * ob,
    )

    # ---- single-block fast path: whole problem VMEM-resident, no padding, no K loop ----
    resident_bytes = M * K * xb + K * N * wb + M * N * ob + M * N * 4
    if resident_bytes <= (4 << 20):
        return pl.pallas_call(
            _gemm_single_kernel,
            out_shape=jax.ShapeDtypeStruct((M, N), out_dtype),
            grid=(1,),
            in_specs=[
                pl.BlockSpec((M, K), lambda i: (0, 0)),
                pl.BlockSpec((K, N), lambda i: (0, 0)),
            ],
            out_specs=pl.BlockSpec((M, N), lambda i: (0, 0)),
            cost_estimate=cost,
        )(x2d, w_t)

    # ---- tiled path ----
    sub = _sublane_multiple(x2d.dtype)

    # Only the contraction axis K needs explicit zero padding (garbage in K corrupts the dot,
    # unlike ragged M/N boundary blocks whose garbage rows/cols are masked on the output write).
    Kp = _round_up(K, 128)
    if Kp <= 1024:
        tk = Kp
    else:
        tk = next(c for c in (1024, 512, 256, 128) if Kp % c == 0)
    if Kp != K:
        x2d = jnp.pad(x2d, ((0, 0), (0, Kp - K)))
        w_t = jnp.pad(w_t, ((0, Kp - K), (0, 0)))

    tm = min(_round_up(M, sub), 512)
    tn = min(_round_up(N, 128), 1024)

    # v7x has 2 TensorCores: ensure at least one "parallel" grid axis has >= 2 blocks for
    # non-tiny problems, otherwise half the chip idles.
    if tm >= M and tn >= N:
        if M > 2 * sub:
            tm = _round_up(_cdiv(M, 2), sub)
        elif N > 256:
            tn = _round_up(_cdiv(N, 2), 128)

    gm, gn, gk = _cdiv(M, tm), _cdiv(N, tn), Kp // tk

    # Double-buffered input/output blocks + f32 scratch accumulator, plus headroom.
    vmem_bytes = 2 * (tm * tk * xb + tk * tn * wb + tm * tn * ob) + tm * tn * 4
    vmem_limit = min(max(vmem_bytes + (8 << 20), 32 << 20), 48 << 20)

    return pl.pallas_call(
        _gemm_tiled_kernel,
        out_shape=jax.ShapeDtypeStruct((M, N), out_dtype),
        grid_spec=pltpu.PrefetchScalarGridSpec(
            num_scalar_prefetch=0,
            grid=(gm, gn, gk),
            in_specs=[
                pl.BlockSpec((tm, tk), lambda i, j, k: (i, k)),
                pl.BlockSpec((tk, tn), lambda i, j, k: (k, j)),
            ],
            out_specs=pl.BlockSpec((tm, tn), lambda i, j, k: (i, j)),
            scratch_shapes=[pltpu.VMEM((tm, tn), jnp.float32)],
        ),
        compiler_params=pltpu.CompilerParams(
            dimension_semantics=("parallel", "parallel", "arbitrary"),
            vmem_limit_bytes=vmem_limit,
        ),
        cost_estimate=cost,
    )(x2d, w_t)


# ---------------------------------------------------------------------------
# TokenMerge forward
# ---------------------------------------------------------------------------
def _merge_tokens(x, tms):
    """rearrange '... f (h nh) (w nw) e -> ... f h w (nh nw e)' with nh = nw = tms."""
    # TODO(synk): this rearrange could be fused into the kernel (tms*tms strided matmuls against
    # a (tms*tms, e, N) view of W) to save one HBM round-trip of the activations.
    *lead, f, H, W, e = x.shape
    L = len(lead)
    x = x.reshape(*lead, f, H // tms, tms, W // tms, tms, e)
    # [..., f, h, nh, w, nw, e] -> [..., f, h, w, nh, nw, e]
    x = x.transpose(*range(L), L, L + 1, L + 3, L + 2, L + 4, L + 5)
    return x.reshape(*lead, f, H // tms, W // tms, tms * tms * e)


def token_merge_forward(hidden_states, patch_resolution, w_t, token_merge_size=2):
    """JAX/Pallas port of TokenMerge.forward. w_t is the Linear weight transposed: (K, out)."""
    tms = token_merge_size
    K, out_features = w_t.shape

    if isinstance(patch_resolution, list):
        if not all(isinstance(res, tuple) for res in patch_resolution):
            raise ValueError(
                f"patch_resolution should be a list of tuples, got {patch_resolution}")
        batch, seq, dim = hidden_states.shape
        merged_seq = seq // (tms * tms)

        # Batch all samples into ONE GEMM: concatenate per-sample merged tokens along M
        # (they share K and the weight), then split the result back per sample.
        rows, row_counts, new_res = [], [], []
        for i, res in enumerate(patch_resolution):
            valid = math.prod(res)
            vh = hidden_states[i, :valid].reshape(res[0], res[1], res[2], dim)
            vm = _merge_tokens(vh, tms).reshape(-1, K)
            rows.append(vm)
            row_counts.append(vm.shape[0])
            new_res.append((res[0], res[1] // tms, res[2] // tms))
        x_all = jnp.concatenate(rows, axis=0)
        out_all = gemm(x_all, w_t, out_dtype=hidden_states.dtype)

        # TODO(synk): the PyTorch spec allocates the padded output with the *input* dim
        # (only valid when out_features == dim); we allocate with out_features.
        output = jnp.zeros((batch, merged_seq, out_features), hidden_states.dtype)
        off = 0
        for i, n in enumerate(row_counts):
            output = output.at[i, :n].set(out_all[off:off + n])
            off += n
        return output, new_res

    if not isinstance(patch_resolution, tuple):
        raise ValueError(f"patch_resolution should be a tuple, got {patch_resolution}")
    batch, seq, dim = hidden_states.shape
    f, h, w = patch_resolution
    x = hidden_states.reshape(batch, f, h, w, dim)
    x = _merge_tokens(x, tms)                                   # b f h' w' K
    pf, ph, pw = x.shape[1:-1]
    out = gemm(x.reshape(-1, K), w_t, out_dtype=hidden_states.dtype)
    out = out.reshape(batch, pf * ph * pw, out_features)
    return out, (pf, ph, pw)


if __name__ == "__main__":
    batch = 2
    in_features = 32
    out_features = 128
    tms = 2
    patch_resolution = (2, 8, 8)           # (f, h, w)
    f, h, w = patch_resolution
    seq = f * h * w                         # 128

    key = jax.random.PRNGKey(0)
    kx, kw, ka, kb = jax.random.split(key, 4)
    hidden_states = jax.random.normal(kx, (batch, seq, in_features), dtype=jnp.float32)

    K = in_features * tms * tms             # 128
    # nn.Linear(K, out_features, bias=False) weight, stored transposed as (K, out).
    w_t = (jax.random.normal(kw, (out_features, K), dtype=jnp.float32)
           * (1.0 / math.sqrt(K))).T

    # ---- tuple path ----
    out, new_res = token_merge_forward(hidden_states, patch_resolution, w_t, tms)
    out = jax.block_until_ready(out)
    xm = _merge_tokens(hidden_states.reshape(batch, f, h, w, in_features), tms)
    ref = jnp.einsum("bfhwk,kn->bfhwn", xm, w_t).reshape(batch, -1, out_features)
    assert out.shape == (batch, f * (h // tms) * (w // tms), out_features)
    assert new_res == (f, h // tms, w // tms)
    assert jnp.allclose(out, ref, atol=3e-2, rtol=1e-2)

    # ---- list path (per-sample resolutions, second sample padded) ----
    res_list = [(2, 8, 8), (2, 8, 4)]
    out_l, res_l_new = token_merge_forward(hidden_states, list(res_list), w_t, tms)
    out_l = jax.block_until_ready(out_l)
    assert out_l.shape == (batch, seq // (tms * tms), out_features)
    assert res_l_new == [(2, 4, 4), (2, 4, 2)]
    v1 = math.prod(res_list[1])
    xm1 = _merge_tokens(hidden_states[1, :v1].reshape(2, 8, 4, in_features), tms)
    ref1 = jnp.einsum("fhwk,kn->fhwn", xm1, w_t).reshape(-1, out_features)
    assert jnp.allclose(out_l[0], ref[0], atol=3e-2, rtol=1e-2)
    assert jnp.allclose(out_l[1, :ref1.shape[0]], ref1, atol=3e-2, rtol=1e-2)
    assert jnp.allclose(out_l[1, ref1.shape[0]:], 0.0)

    # ---- tiled-path GEMM check (K zero-padding, gk > 1, ragged M/N boundary blocks) ----
    a = jax.random.normal(ka, (1000, 1200), dtype=jnp.float32)
    b = jax.random.normal(kb, (1200, 300), dtype=jnp.float32)
    got = jax.block_until_ready(gemm(a, b))
    ref_ab = jnp.dot(a, b, precision=jax.lax.Precision.HIGHEST)
    assert got.shape == (1000, 300)
    assert jnp.allclose(got, ref_ab, atol=1.0, rtol=2e-2)

    print("KERNEL_OK")
</pallas_src>

<mosaic_0001>
module attributes {stable_mosaic.version = 11 : i64} {
  func.func @_gemm_single_kernel(%arg0: i32, %arg1: memref<64x128xf32, #tpu.memory_space<vmem>>, %arg2: memref<128x128xf32, #tpu.memory_space<vmem>>, %arg3: memref<64x128xf32, #tpu.memory_space<vmem>>) attributes {dimension_semantics = [#tpu.dimension_semantics<arbitrary>], iteration_bounds = array<i64: 1>, scalar_prefetch = 0 : i64, scratch_operands = 0 : i64, tpu.core_type = #tpu.core_type<tc>, window_params = [{pipeline_mode = #tpu.pipeline_mode<synchronous>, transform_indices = @transform_0, window_bounds = array<i64: 64, 128>}, {pipeline_mode = #tpu.pipeline_mode<synchronous>, transform_indices = @transform_1, window_bounds = array<i64: 128, 128>}, {pipeline_mode = #tpu.pipeline_mode<synchronous>, transform_indices = @transform_2, window_bounds = array<i64: 64, 128>}]} {
    %c0 = arith.constant 0 : index
    %c0_0 = arith.constant 0 : index
    %0 = vector.load %arg1[%c0, %c0_0] : memref<64x128xf32, #tpu.memory_space<vmem>>, vector<64x128xf32>
    %c0_1 = arith.constant 0 : index
    %c0_2 = arith.constant 0 : index
    %1 = vector.load %arg2[%c0_1, %c0_2] : memref<128x128xf32, #tpu.memory_space<vmem>>, vector<128x128xf32>
    %cst = arith.constant dense<0.000000e+00> : vector<64x128xf32>
    %2 = tpu.matmul %0, %1, %cst {dimension_numbers = #tpu.dot_dimension_numbers<[1], [0], [0], [1], [0, 0, 1, 1], [], []>} : vector<64x128xf32>, vector<128x128xf32>, vector<64x128xf32> -> vector<64x128xf32>
    %c0_3 = arith.constant 0 : index
    %c0_4 = arith.constant 0 : index
    %3 = vector.load %arg3[%c0_3, %c0_4] : memref<64x128xf32, #tpu.memory_space<vmem>>, vector<64x128xf32>
    tpu.vector_store %arg3[%c0_3, %c0_4], %2 {strides = array<i32>} : memref<64x128xf32, #tpu.memory_space<vmem>>, vector<64x128xf32>,
    return
  }
  func.func @transform_0(%arg0: i32) -> (i32, i32) {
    %c0_i32 = arith.constant 0 : i32
    %c0_i32_0 = arith.constant 0 : i32
    %c0_i32_1 = arith.constant 0 : i32
    return %c0_i32, %c0_i32_0 : i32, i32
  }
  func.func @transform_1(%arg0: i32) -> (i32, i32) {
    %c0_i32 = arith.constant 0 : i32
    %c0_i32_0 = arith.constant 0 : i32
    %c0_i32_1 = arith.constant 0 : i32
    return %c0_i32, %c0_i32_0 : i32, i32
  }
  func.func @transform_2(%arg0: i32) -> (i32, i32) {
    %c0_i32 = arith.constant 0 : i32
    %c0_i32_0 = arith.constant 0 : i32
    %c0_i32_1 = arith.constant 0 : i32
    return %c0_i32, %c0_i32_0 : i32, i32
  }
}

</mosaic_0001>

<bundles_post_ra>
// kernel: tpu_custom_call.1
= control target key start
LH: loop header
LB: loop body
LE: loop exit
PB: predicated region body
PF: predicated region fallthrough
CT: control target
= control target key end

     0   :  { %7 = vsyncpa [#allocation3], 0  ;;  %s453_s0 = inlined_call_operand.hbm [shape: f32[64,128], index: 0, kind: input, shape index: {}]   ;;  %s454_s1 = inlined_call_operand.hbm [shape: f32[128,128], index: 1, kind: input, shape index: {}]   ;;  %s455_s2 = inlined_call_operand.hbm [shape: f32[64,128], index: 2, kind: output, shape index: {}]  }
   0x1   :  { %8 = vsyncpa [#allocation6], 0 }
   0x2   :  { %9 = vsyncpa [#allocation4], 0  ;;  %s388_s9 = smov [#allocation2]   ;;  %s316_s13 = scalar_lea.hbm %s453_s0, 1024 }
   0x3   :  { %s15_s10 = sshll.u32 %s388_s9, 4  ;;  %p317_p0 = scmp.ne.s32.totalorder %s453_s0, %s316_s13  ;;  %s16_s10 = int_to_ptr.vmem [resolvable:$true] %s15_s10 }
   0x4   :  { %p320_p1 = scmp.lt.u32.totalorder %s316_s13, %s453_s0 }
   0x6   :  { %p322_p2 = pnand %p320_p1, %p317_p0 }
   0x8   :  { %325 = shalt.err (!%p322_p2)
}
   0x9   :  { %s326_s18 = scalar_lea.vmem %s16_s10, 1024  ;;  %p331_p4 = scmp.lt.s32.totalorder %s16_s10, %s16_s10 }
   0xa   :  { %p327_p3 = scmp.ne.s32.totalorder %s16_s10, %s326_s18  ;;  %p332_p5 = scmp.lt.s32.totalorder %s326_s18, %s326_s18 }
   0xc   :  { %p333_p6 = por %p332_p5, %p331_p4 }
   0xe   :  { %p334_p7 = pnand %p333_p6, %p327_p3 }
  0x10   :  { %337 = shalt.err (!%p334_p7)
}
  0x11   :  { %s389_s19 = smov 128   ;;  %s390_s20 = smov 8  }
  0x12   :  { %21 = dma.hbm_to_vmem [thread:$0]  %s453_s0, 1024, %s16_s10, [#allocation3], %s389_s19, %s389_s19, %s390_s20  }
  0x13   :  { %s391_s23 = smov [#allocation5]   ;;  %s338_s27 = scalar_lea.hbm %s454_s1, 2048 }
  0x14   :  { %s27_s24 = sshll.u32 %s391_s23, 4  ;;  %p339_p8 = scmp.ne.s32.totalorder %s454_s1, %s338_s27  ;;  %s28_s24 = int_to_ptr.vmem [resolvable:$true] %s27_s24 }
  0x15   :  { %p342_p9 = scmp.lt.u32.totalorder %s338_s27, %s454_s1 }
  0x17   :  { %p344_p10 = pnand %p342_p9, %p339_p8 }
  0x19   :  { %347 = shalt.err (!%p344_p10)
}
  0x1a   :  { %s348_s4 = scalar_lea.vmem %s28_s24, 2048  ;;  %p353_p12 = scmp.lt.s32.totalorder %s28_s24, %s28_s24 }
  0x1b   :  { %p349_p11 = scmp.ne.s32.totalorder %s28_s24, %s348_s4  ;;  %p354_p13 = scmp.lt.s32.totalorder %s348_s4, %s348_s4 }
  0x1d   :  { %p355_p0 = por %p354_p13, %p353_p12 }
  0x1f   :  { %p356_p1 = pnand %p355_p0, %p349_p11 }
  0x21   :  { %359 = shalt.err (!%p356_p1)
}
  0x22   :  { %33 = dma.hbm_to_vmem [thread:$0]  %s454_s1, 2048, %s28_s24, [#allocation6], %s389_s19, %s389_s19, %s390_s20  }
  0x23   :  { %382 = dma.done.wait [#allocation3], 1024  }
  0x24   :  { %383 = vsyncadd [#allocation3], 4294966272 }
  0x25   :  { %384 = dma.done.wait [#allocation6], 2048  }
  0x26   :  { %385 = vsyncadd [#allocation6], 4294965248  ;;  %v48_v0 = vld [vmem:[#allocation5] sm:$0xff]  ;;  %v49_v1 = vld [vmem:[#allocation5 + $0x8] sm:$0xff]  ;;  %s392_s1 = smov [#allocation7]  }
  0x27   :  { %v50_v2 = vld [vmem:[#allocation5 + $0x10] sm:$0xff]  ;;  %v263_v3 = vpack.c.bf16 %v49_v1, %v48_v0  ;;  %v51_v4 = vld [vmem:[#allocation5 + $0x18] sm:$0xff]  ;;  %v52_v6 = vld [vmem:[#allocation5 + $0x20] sm:$0xff]  ;;  %s182_s6 = sshll.u32 %s392_s1, 4  ;;  %s183_s6 = int_to_ptr.vmem [resolvable:$true] %s182_s6 }
  0x28   :  { %v267_v5 = vpack.c.bf16 %v51_v4, %v50_v2  ;;  %v53_v7 = vld [vmem:[#allocation5 + $0x28] sm:$0xff]  ;;  %v40_v9 = vld [vmem:[#allocation2] sm:$0xff]  ;;  %v54_v11 = vld [vmem:[#allocation5 + $0x30] sm:$0xff]  ;;  %s360_s7 = scalar_lea.vmem %s183_s6, 1024  ;;  %p365_p3 = scmp.lt.s32.totalorder %s183_s6, %s183_s6 }
  0x29   :  { %264 = vmatprep.subr.bf16.mxu0 %v263_v3  ;;  %295 = vmatprep.subr.bf16.mxu1 %v263_v3  ;;  %v271_v8 = vpack.c.bf16 %v53_v7, %v52_v6  ;;  %v44_v10 = vld [vmem:[#allocation2 + $0x20] sm:$0xff]  ;;  %v55_v12 = vld [vmem:[#allocation5 + $0x38] sm:$0xff]  ;;  %v57_v15 = vld [vmem:[#allocation5 + $0x48] sm:$0xff]  ;;  %p361_p2 = scmp.ne.s32.totalorder %s183_s6, %s360_s7  ;;  %p366_p4 = scmp.lt.s32.totalorder %s360_s7, %s360_s7 }
  0x2a   :  { %266 = vmatpush3.bf16.msra.mxu0 %v263_v3  ;;  %303 = vmatpush3.bf16.msra.mxu1 %v263_v3  ;;  %v275_v13 = vpack.c.bf16 %v55_v12, %v54_v11  ;;  %v56_v14 = vld [vmem:[#allocation5 + $0x40] sm:$0xff]  ;;  %v58_v17 = vld [vmem:[#allocation5 + $0x50] sm:$0xff]  ;;  %v59_v18 = vld [vmem:[#allocation5 + $0x58] sm:$0xff] }
  0x2b   :  { %268 = vmatprep.subr.bf16.mxu0 %v267_v5  ;;  %296 = vmatprep.subr.bf16.mxu1 %v267_v5  ;;  %v279_v16 = vpack.c.bf16 %v57_v15, %v56_v14  ;;  %v283_v19 = vpack.c.bf16 %v59_v18, %v58_v17  ;;  %v60_v20 = vld [vmem:[#allocation5 + $0x60] sm:$0xff]  ;;  %v61_v21 = vld [vmem:[#allocation5 + $0x68] sm:$0xff]  ;;  %v62_v23 = vld [vmem:[#allocation5 + $0x70] sm:$0xff]  ;;  %p367_p5 = por %p366_p4, %p365_p3 }
  0x2c   :  { %251 = vmatprep.mubr.f32.mxu0 %v40_v9  ;;  %257 = vmatprep.mubr.f32.mxu1 %v44_v10  ;;  %v287_v22 = vpack.c.bf16 %v61_v21, %v60_v20  ;;  %v63_v24 = vld [vmem:[#allocation5 + $0x78] sm:$0xff]  ;;  %v41_v26 = vld [vmem:[#allocation2 + $0x8] sm:$0xff]  ;;  %v42_v28 = vld [vmem:[#allocation2 + $0x10] sm:$0xff] }
  0x2d   :  { %v291_v25 = vpack.c.bf16 %v63_v24, %v62_v23  ;;  %v45_v27 = vld [vmem:[#allocation2 + $0x28] sm:$0xff]  ;;  %v46_v29 = vld [vmem:[#allocation2 + $0x30] sm:$0xff]  ;;  %v43_v30 = vld [vmem:[#allocation2 + $0x18] sm:$0xff]  ;;  %p368_p6 = pnand %p367_p5, %p361_p2 }
  0x2e   :  { %270 = vmatpush3.bf16.msra.mxu0 %v267_v5  ;;  %304 = vmatpush3.bf16.msra.mxu1 %v267_v5  ;;  %v47_v31 = vld [vmem:[#allocation2 + $0x38] sm:$0xff] }
  0x2f   :  { %272 = vmatprep.subr.bf16.mxu0 %v271_v8  ;;  %297 = vmatprep.subr.bf16.mxu1 %v271_v8 }
  0x32   :  { %274 = vmatpush3.bf16.msra.mxu0 %v271_v8  ;;  %305 = vmatpush3.bf16.msra.mxu1 %v271_v8 }
  0x33   :  { %276 = vmatprep.subr.bf16.mxu0 %v275_v13  ;;  %298 = vmatprep.subr.bf16.mxu1 %v275_v13 }
  0x36   :  { %278 = vmatpush3.bf16.msra.mxu0 %v275_v13  ;;  %306 = vmatpush3.bf16.msra.mxu1 %v275_v13 }
  0x37   :  { %280 = vmatprep.subr.bf16.mxu0 %v279_v16  ;;  %299 = vmatprep.subr.bf16.mxu1 %v279_v16 }
  0x3a   :  { %282 = vmatpush3.bf16.msra.mxu0 %v279_v16  ;;  %307 = vmatpush3.bf16.msra.mxu1 %v279_v16 }
  0x3b   :  { %284 = vmatprep.subr.bf16.mxu0 %v283_v19  ;;  %300 = vmatprep.subr.bf16.mxu1 %v283_v19 }
  0x3e   :  { %286 = vmatpush3.bf16.msra.mxu0 %v283_v19  ;;  %308 = vmatpush3.bf16.msra.mxu1 %v283_v19 }
  0x3f   :  { %288 = vmatprep.subr.bf16.mxu0 %v287_v22  ;;  %301 = vmatprep.subr.bf16.mxu1 %v287_v22 }
  0x42   :  { %290 = vmatpush3.bf16.msra.mxu0 %v287_v22  ;;  %309 = vmatpush3.bf16.msra.mxu1 %v287_v22 }
  0x43   :  { %292 = vmatprep.subr.bf16.mxu0 %v291_v25  ;;  %302 = vmatprep.subr.bf16.mxu1 %v291_v25 }
  0x46   :  { %294 = vmatpush3.bf16.msra.mxu0 %v291_v25  ;;  %310 = vmatpush3.bf16.msra.mxu1 %v291_v25 }
  0x49   :  { %252 = vmatmul.mubr.f32.vlgmr.msra.gmra.mrb[0].mxu0 %v41_v26  ;;  %258 = vmatmul.mubr.f32.vlgmr.msra.gmra.mrb[0].mxu1 %v45_v27 }
  0x4a   :  { %254 = vmatprep.mubr.f32.mxu0 %v42_v28  ;;  %260 = vmatprep.mubr.f32.mxu1 %v46_v29 }
  0x4d   :  { %255 = vmatmul.mubr.f32.gmra.mrb[2].mxu0 %v43_v30  ;;  %261 = vmatmul.mubr.f32.gmra.mrb[2].mxu1 %v47_v31 }
 0x11c   :  { %v253_v32 = vpop.f32.mrb[0].mxu0  ;;  %v259_v33 = vpop.f32.mrb[0].mxu1 }
 0x11d   :  { %170 = vst [vmem:[#allocation7 + $0x8] sm:$0xff] %v253_v32  ;;  %174 = vst [vmem:[#allocation7 + $0x28] sm:$0xff] %v259_v33  ;;  %v130_v34 = vpop.f32.mrb[1].mxu0  ;;  %v150_v35 = vpop.f32.mrb[1].mxu1 }
 0x11e   :  { %169 = vst [vmem:[#allocation7] sm:$0xff] %v130_v34  ;;  %173 = vst [vmem:[#allocation7 + $0x20] sm:$0xff] %v150_v35 }
 0x120   :  { %v256_v36 = vpop.f32.mrb[2].mxu0  ;;  %v262_v37 = vpop.f32.mrb[2].mxu1 }
 0x121   :  { %172 = vst [vmem:[#allocation7 + $0x18] sm:$0xff] %v256_v36  ;;  %176 = vst [vmem:[#allocation7 + $0x38] sm:$0xff] %v262_v37  ;;  %v140_v38 = vpop.f32.mrb[3].mxu0  ;;  %v160_v39 = vpop.f32.mrb[3].mxu1 }
 0x122   :  { %171 = vst [vmem:[#allocation7 + $0x10] sm:$0xff] %v140_v38  ;;  %175 = vst [vmem:[#allocation7 + $0x30] sm:$0xff] %v160_v39 }
 0x123   :  { %371 = shalt.err (!%p368_p6)
}
 0x124   :  { %s372_s10 = scalar_lea.hbm %s455_s2, 1024 }
 0x125   :  { %p373_p7 = scmp.ne.s32.totalorder %s455_s2, %s372_s10  ;;  %p376_p8 = scmp.lt.u32.totalorder %s372_s10, %s455_s2 }
 0x127   :  { %p378_p9 = pnand %p376_p8, %p373_p7 }
 0x129   :  { %381 = shalt.err (!%p378_p9)
}
 0x12a   :  { %188 = dma.vmem_to_hbm [thread:$0]  %s183_s6, 1024, %s455_s2, [#allocation4], %s389_s19, %s389_s19, %s390_s20  }
 0x12b   :  { %386 = dma.done.wait [#allocation4], 1024  }
 0x12c   :  { %387 = vsyncadd [#allocation4], 4294966272 }
 0x12d   :  { %192 = vsyncpa [#allocation3], 1 }
 0x12e   :  { %193 = vsyncpa [#allocation6], 1 }
 0x12f   :  { %194 = vsyncpa [#allocation4], 1 }

</bundles_post_ra>
